<compile_context>
chip_gen: v6e
topology: v6e:2x2x1
jax: 0.10.0
libtpu: 0.0.40
codegen_flags: <defaults>
</compile_context>

<pallas_src>
import functools

import jax
import jax.numpy as jnp
from jax.experimental import pallas as pl
from jax.experimental.pallas import tpu as pltpu

LANE = 128


def _round_up(x, m):
    return (x + m - 1) // m * m


def _pad2(a, shape):
    return jnp.pad(a, [(0, s - d) for d, s in zip(a.shape, shape)])


def _pick_tile(n_pad):
    # Largest tile that divides the 128-padded node count (no zero-pad inflation
    # of the dominant A stream) while leaving >= 2 row blocks for v7x megacore.
    for t in (2048, 1024, 512, 256, 128):
        if n_pad % t == 0 and n_pad // t >= 2:
            return t
    return n_pad  # tiny graphs: a single row block


def _vmem_limit_bytes(est_vmem):
    # Generation-aware cap: v5e/v6e have 128 MiB physical VMEM, v7x only 64 MiB.
    try:
        kind = jax.devices()[0].device_kind.lower()
    except Exception:
        kind = ""
    cap = 100 * 1024 * 1024 if ("v5" in kind or "v6" in kind) else 56 * 1024 * 1024
    return int(min(cap, max(32 * 1024 * 1024, 2 * est_vmem)))


# ---------------------------------------------------------------------------
# Pallas kernel: one SAGEConv layer, tiled over (row blocks, neighbor blocks)
# ---------------------------------------------------------------------------
def sage_layer_kernel(a_ref, x_ref, dinv_ref, w_ref, b_ref, o_ref, acc_ref,
                      *, apply_relu, f_pad, tile):
    i = pl.program_id(0)
    k = pl.program_id(1)

    # Neighbor chunk k from the layer-resident node-feature slab.
    x_nb = x_ref[pl.ds(pl.multiple_of(k * tile, tile), tile), :]

    # Partial mean-agg *numerator*: int8 counts -> bf16 (exact) @ X, f32 accumulate.
    part = jnp.dot(a_ref[...].astype(x_nb.dtype), x_nb,
                   preferred_element_type=jnp.float32)

    @pl.when(k == 0)
    def _init():
        # Fold zero-init into the first partial sum; stash root features so the
        # projection is one fused MXU dot over concat([agg, x_root]).
        acc_ref[:, :f_pad] = part
        acc_ref[:, f_pad:] = x_ref[
            pl.ds(pl.multiple_of(i * tile, tile), tile), :
        ].astype(jnp.float32)

    @pl.when(k > 0)
    def _accum():
        acc_ref[:, :f_pad] = acc_ref[:, :f_pad] + part

    @pl.when(k == pl.num_programs(1) - 1)
    def _finalize():
        # Exact mean: integer-count sums scaled by per-row 1/deg in f32.
        acc_ref[:, :f_pad] = acc_ref[:, :f_pad] * dinv_ref[...]
        feat = acc_ref[...].astype(w_ref.dtype)
        out = jnp.dot(feat, w_ref[...], preferred_element_type=jnp.float32) + b_ref[...]
        if apply_relu:
            out = jnp.maximum(out, 0.0)
        o_ref[...] = out.astype(o_ref.dtype)


def sage_layer(a, x, deg_inv, w_cat, b, *, tile, apply_relu, out_dtype):
    """a: (Np,Np) int8 counts; x: (Np,Fp) bf16; deg_inv: (Np,1) f32;
       w_cat: (2Fp,Hp) bf16; b: (1,Hp) f32."""
    n_pad, f_pad = x.shape
    h_pad = w_cat.shape[1]
    grid = (n_pad // tile, n_pad // tile)

    kernel = functools.partial(sage_layer_kernel, apply_relu=apply_relu,
                               f_pad=f_pad, tile=tile)

    out_bytes = jnp.dtype(out_dtype).itemsize
    # Advisory cost estimate (lets XLA schedule glue around the custom call).
    flops = 2 * n_pad * n_pad * f_pad + 2 * n_pad * (2 * f_pad) * h_pad
    bytes_accessed = (
        n_pad * n_pad * 1                      # A counts (int8), each tile read once
        + n_pad * f_pad * 2                    # node features, DMA'd once (resident)
        + n_pad * 4                            # per-row 1/deg
        + 2 * f_pad * h_pad * 2 + h_pad * 4    # weights + bias
        + n_pad * h_pad * out_bytes            # output
    )
    # VMEM budget: double-buffered A tiles / output + resident X slab + scratch.
    est_vmem = (
        2 * tile * tile * 1                    # A tiles (int8)
        + 2 * n_pad * f_pad * 2                # resident node-feature slab
        + 2 * tile * LANE * 4                  # 1/deg column (lane-padded)
        + 2 * 2 * f_pad * h_pad * 2            # fused weights
        + 2 * LANE * h_pad * 4                 # bias (sublane-padded)
        + 2 * tile * h_pad * out_bytes         # output tile
        + tile * 2 * f_pad * 4                 # accumulator scratch
    )

    return pl.pallas_call(
        kernel,
        out_shape=jax.ShapeDtypeStruct((n_pad, h_pad), out_dtype),
        grid_spec=pltpu.PrefetchScalarGridSpec(
            num_scalar_prefetch=0,
            grid=grid,
            in_specs=[
                pl.BlockSpec((tile, tile), lambda i, k: (i, k)),        # A counts tile
                pl.BlockSpec((n_pad, f_pad), lambda i, k: (0, 0)),      # resident X slab
                pl.BlockSpec((tile, 1), lambda i, k: (i, 0)),           # per-row 1/deg
                pl.BlockSpec((2 * f_pad, h_pad), lambda i, k: (0, 0)),  # fused [W_l; W_r]
                pl.BlockSpec((1, h_pad), lambda i, k: (0, 0)),          # bias
            ],
            out_specs=pl.BlockSpec((tile, h_pad), lambda i, k: (i, 0)),
            scratch_shapes=[pltpu.VMEM((tile, 2 * f_pad), jnp.float32)],
        ),
        compiler_params=pltpu.CompilerParams(
            dimension_semantics=("parallel", "arbitrary"),
            vmem_limit_bytes=_vmem_limit_bytes(est_vmem),
        ),
        cost_estimate=pl.CostEstimate(
            flops=int(flops), transcendentals=0, bytes_accessed=int(bytes_accessed)
        ),
    )(a, x, deg_inv, w_cat, b)


# ---------------------------------------------------------------------------
# Glue: edge_index -> dense int8 edge-count matrix + per-row 1/deg (exact mean)
# ---------------------------------------------------------------------------
def build_adjacency(edge_index, n_pad):
    src, dst = edge_index[0], edge_index[1]  # message flows src (j) -> dst (i)
    # Counts scattered directly into the padded kernel-dtype buffer (one pass).
    counts = jnp.zeros((n_pad, n_pad), jnp.int8).at[dst, src].add(jnp.int8(1))
    deg = jnp.zeros((n_pad,), jnp.float32).at[dst].add(1.0)
    deg_inv = (1.0 / jnp.maximum(deg, 1.0)).reshape(n_pad, 1)  # isolated rows stay 0 agg
    return counts, deg_inv


# ---------------------------------------------------------------------------
# WidthGNNEncoder forward
# ---------------------------------------------------------------------------
def width_gnn_encoder(x, edge_index, params):
    n, f_in = x.shape
    hid = params["w1_l"].shape[1]
    out_ch = params["w2_l"].shape[1]

    # Nodes / features padded only to 128 (never rounded up to a tile multiple).
    n_pad = _round_up(n, LANE)
    f_pad = _round_up(f_in, LANE)
    h_pad = _round_up(hid, LANE)
    o_pad = _round_up(out_ch, LANE)
    tile = _pick_tile(n_pad)

    a, deg_inv = build_adjacency(edge_index, n_pad)
    x_p = _pad2(x, (n_pad, f_pad)).astype(jnp.bfloat16)

    # Fused projection weights per layer: [W_l ; W_r]  (single MXU dot in-kernel).
    w1 = jnp.concatenate(
        [_pad2(params["w1_l"], (f_pad, h_pad)), _pad2(params["w1_r"], (f_pad, h_pad))],
        axis=0,
    ).astype(jnp.bfloat16)
    b1 = _pad2(params["b1_l"], (1, h_pad)).astype(jnp.float32)
    w2 = jnp.concatenate(
        [_pad2(params["w2_l"], (h_pad, o_pad)), _pad2(params["w2_r"], (h_pad, o_pad))],
        axis=0,
    ).astype(jnp.bfloat16)
    b2 = _pad2(params["b2_l"], (1, o_pad)).astype(jnp.float32)

    # Layer 1 emits bf16 directly (no inter-layer f32 write + cast pass).
    h = sage_layer(a, x_p, deg_inv, w1, b1, tile=tile, apply_relu=True,
                   out_dtype=jnp.bfloat16)                      # conv1 + ReLU
    out = sage_layer(a, h, deg_inv, w2, b2, tile=tile, apply_relu=False,
                     out_dtype=jnp.float32)                     # conv2
    return out[:n, :out_ch]


def init_params(key, in_channels, hidden_channels, out_channels):
    k1, k2, k3, k4 = jax.random.split(key, 4)
    s1 = 1.0 / jnp.sqrt(jnp.float32(in_channels))
    s2 = 1.0 / jnp.sqrt(jnp.float32(hidden_channels))
    return {
        # conv1: lin_l (with bias) and lin_r (no bias)
        "w1_l": jax.random.normal(k1, (in_channels, hidden_channels), jnp.float32) * s1,
        "w1_r": jax.random.normal(k2, (in_channels, hidden_channels), jnp.float32) * s1,
        "b1_l": jnp.zeros((1, hidden_channels), jnp.float32),
        # conv2
        "w2_l": jax.random.normal(k3, (hidden_channels, out_channels), jnp.float32) * s2,
        "w2_r": jax.random.normal(k4, (hidden_channels, out_channels), jnp.float32) * s2,
        "b2_l": jnp.zeros((1, out_channels), jnp.float32),
    }


def reference(x, edge_index, params):
    # Pure-JAX f32 reference of the same forward pass.
    n = x.shape[0]
    src, dst = edge_index[0], edge_index[1]
    adj = jnp.zeros((n, n), jnp.float32).at[dst, src].add(1.0)
    deg = jnp.clip(adj.sum(axis=1, keepdims=True), 1.0, None)
    a = adj / deg

    def layer(a, x, wl, wr, bl):
        return (a @ x) @ wl + x @ wr + bl

    h = jax.nn.relu(layer(a, x, params["w1_l"], params["w1_r"], params["b1_l"]))
    return layer(a, h, params["w2_l"], params["w2_r"], params["b2_l"])


if __name__ == "__main__":
    key = jax.random.PRNGKey(0)
    k_x, k_src, k_dst, k_w = jax.random.split(key, 4)

    N, IN_CH, HID_CH, OUT_CH, E = 8, 16, 32, 16, 16

    x = jax.random.normal(k_x, (N, IN_CH), jnp.float32)
    src = jax.random.randint(k_src, (E,), 0, N, dtype=jnp.int32)
    dst = jax.random.randint(k_dst, (E,), 0, N, dtype=jnp.int32)
    edge_index = jnp.stack([src, dst], axis=0)  # [2, E]

    params = init_params(k_w, IN_CH, HID_CH, OUT_CH)

    fwd = jax.jit(width_gnn_encoder)
    out = fwd(x, edge_index, params)
    jax.block_until_ready(out)
    assert out.shape == (N, OUT_CH)
    assert bool(jnp.all(jnp.isfinite(out)))

    # Check vs f32 reference (aggregation is exact; remaining error is bf16 matmul).
    ref = reference(x, edge_index, params)
    max_err = float(jnp.max(jnp.abs(out - ref)))
    assert max_err < 0.5, f"max abs error {max_err}"

    print("KERNEL_OK")
</pallas_src>

<mosaic_0001>
module attributes {stable_mosaic.version = 11 : i64} {
  func.func private @main(%arg0: i32) attributes {dimension_semantics = [#tpu.dimension_semantics<core_parallel>], iteration_bounds = array<i64: 2>, tpu.core_type = #tpu.core_type<sc_scalar_subcore>, window_params = []} {
    return
  }
}

module attributes {stable_mosaic.version = 11 : i64} {
  func.func private @main(%arg0: i32) attributes {dimension_semantics = [#tpu.dimension_semantics<core_parallel>], iteration_bounds = array<i64: 2>, tpu.core_type = #tpu.core_type<sc_scalar_subcore>, window_params = []} {
    return
  }
}

module attributes {stable_mosaic.version = 11 : i64} {
  func.func @sage_layer_kernel(%arg0: i32, %arg1: i32, %arg2: memref<128x128xi8, #tpu.memory_space<vmem>>, %arg3: memref<128x128xbf16, #tpu.memory_space<vmem>>, %arg4: memref<128x1xf32, #tpu.memory_space<vmem>>, %arg5: memref<256x128xbf16, #tpu.memory_space<vmem>>, %arg6: memref<1x128xf32, #tpu.memory_space<vmem>>, %arg7: memref<128x128xbf16, #tpu.memory_space<vmem>>, %arg8: memref<128x256xf32, #tpu.memory_space<vmem>>) attributes {dimension_semantics = [#tpu.dimension_semantics<parallel>, #tpu.dimension_semantics<arbitrary>], iteration_bounds = array<i64: 1, 1>, scalar_prefetch = 0 : i64, scratch_operands = 1 : i64, tpu.core_type = #tpu.core_type<tc>, window_params = [{transform_indices = @transform_0, window_bounds = array<i64: 128, 128>}, {pipeline_mode = #tpu.pipeline_mode<synchronous>, transform_indices = @transform_1, window_bounds = array<i64: 128, 128>}, {transform_indices = @transform_2, window_bounds = array<i64: 128, 1>}, {pipeline_mode = #tpu.pipeline_mode<synchronous>, transform_indices = @transform_3, window_bounds = array<i64: 256, 128>}, {pipeline_mode = #tpu.pipeline_mode<synchronous>, transform_indices = @transform_4, window_bounds = array<i64: 1, 128>}, {transform_indices = @transform_5, window_bounds = array<i64: 128, 128>}]} {
    %c128_i32 = arith.constant 128 : i32
    %0 = arith.muli %arg1, %c128_i32 : i32
    %1 = tpu.assume_multiple %0, 128 : i32
    %2 = arith.index_cast %1 : i32 to index
    %c0 = arith.constant 0 : index
    %3 = vector.load %arg3[%2, %c0] : memref<128x128xbf16, #tpu.memory_space<vmem>>, vector<128x128xbf16>
    %c0_0 = arith.constant 0 : index
    %c0_1 = arith.constant 0 : index
    %4 = vector.load %arg2[%c0_0, %c0_1] : memref<128x128xi8, #tpu.memory_space<vmem>>, vector<128x128xi8>
    %5 = arith.sitofp %4 : vector<128x128xi8> to vector<128x128xbf16>
    %cst = arith.constant dense<0.000000e+00> : vector<128x128xf32>
    %6 = tpu.matmul %5, %3, %cst {dimension_numbers = #tpu.dot_dimension_numbers<[1], [0], [0], [1], [0, 0, 1, 1], [], []>} : vector<128x128xbf16>, vector<128x128xbf16>, vector<128x128xf32> -> vector<128x128xf32>
    %c0_i32 = arith.constant 0 : i32
    %7 = arith.cmpi eq, %arg1, %c0_i32 : i32
    %8 = arith.extui %7 : i1 to i32
    %c0_i32_2 = arith.constant 0 : i32
    %9 = arith.cmpi ne, %8, %c0_i32_2 : i32
    scf.if %9 {
      %c0_7 = arith.constant 0 : index
      %c0_8 = arith.constant 0 : index
      %16 = vector.load %arg8[%c0_7, %c0_8] : memref<128x256xf32, #tpu.memory_space<vmem>>, vector<128x128xf32>
      tpu.vector_store %arg8[%c0_7, %c0_8], %6 {strides = array<i32>} : memref<128x256xf32, #tpu.memory_space<vmem>>, vector<128x128xf32>,
      %c128_i32_9 = arith.constant 128 : i32
      %17 = arith.muli %arg0, %c128_i32_9 : i32
      %18 = tpu.assume_multiple %17, 128 : i32
      %19 = arith.index_cast %18 : i32 to index
      %c0_10 = arith.constant 0 : index
      %20 = vector.load %arg3[%19, %c0_10] : memref<128x128xbf16, #tpu.memory_space<vmem>>, vector<128x128xbf16>
      %21 = arith.extf %20 : vector<128x128xbf16> to vector<128x128xf32>
      %c0_11 = arith.constant 0 : index
      %c128 = arith.constant 128 : index
      %22 = vector.load %arg8[%c0_11, %c128] : memref<128x256xf32, #tpu.memory_space<vmem>>, vector<128x128xf32>
      tpu.vector_store %arg8[%c0_11, %c128], %21 {strides = array<i32>} : memref<128x256xf32, #tpu.memory_space<vmem>>, vector<128x128xf32>,
    } else {
    }
    %c0_i32_3 = arith.constant 0 : i32
    %10 = arith.cmpi sgt, %arg1, %c0_i32_3 : i32
    %11 = arith.extui %10 : i1 to i32
    %c0_i32_4 = arith.constant 0 : i32
    %12 = arith.cmpi ne, %11, %c0_i32_4 : i32
    scf.if %12 {
      %c0_7 = arith.constant 0 : index
      %c0_8 = arith.constant 0 : index
      %16 = vector.load %arg8[%c0_7, %c0_8] : memref<128x256xf32, #tpu.memory_space<vmem>>, vector<128x128xf32>
      %17 = arith.addf %16, %6 : vector<128x128xf32>
      %c0_9 = arith.constant 0 : index
      %c0_10 = arith.constant 0 : index
      %18 = vector.load %arg8[%c0_9, %c0_10] : memref<128x256xf32, #tpu.memory_space<vmem>>, vector<128x128xf32>
      tpu.vector_store %arg8[%c0_9, %c0_10], %17 {strides = array<i32>} : memref<128x256xf32, #tpu.memory_space<vmem>>, vector<128x128xf32>,
    } else {
    }
    %c0_i32_5 = arith.constant 0 : i32
    %13 = arith.cmpi eq, %arg1, %c0_i32_5 : i32
    %14 = arith.extui %13 : i1 to i32
    %c0_i32_6 = arith.constant 0 : i32
    %15 = arith.cmpi ne, %14, %c0_i32_6 : i32
    scf.if %15 {
      %c0_7 = arith.constant 0 : index
      %c0_8 = arith.constant 0 : index
      %16 = vector.load %arg8[%c0_7, %c0_8] : memref<128x256xf32, #tpu.memory_space<vmem>>, vector<128x128xf32>
      %c0_9 = arith.constant 0 : index
      %c0_10 = arith.constant 0 : index
      %17 = vector.load %arg4[%c0_9, %c0_10] : memref<128x1xf32, #tpu.memory_space<vmem>>, vector<128x1xf32>
      %18 = vector.broadcast %17 : vector<128x1xf32> to vector<128x128xf32>
      %19 = arith.mulf %16, %18 : vector<128x128xf32>
      %c0_11 = arith.constant 0 : index
      %c0_12 = arith.constant 0 : index
      %20 = vector.load %arg8[%c0_11, %c0_12] : memref<128x256xf32, #tpu.memory_space<vmem>>, vector<128x128xf32>
      tpu.vector_store %arg8[%c0_11, %c0_12], %19 {strides = array<i32>} : memref<128x256xf32, #tpu.memory_space<vmem>>, vector<128x128xf32>,
      %c0_13 = arith.constant 0 : index
      %c0_14 = arith.constant 0 : index
      %21 = vector.load %arg8[%c0_13, %c0_14] : memref<128x256xf32, #tpu.memory_space<vmem>>, vector<128x256xf32>
      %22 = arith.truncf %21 : vector<128x256xf32> to vector<128x256xbf16>
      %c0_15 = arith.constant 0 : index
      %c0_16 = arith.constant 0 : index
      %23 = vector.load %arg5[%c0_15, %c0_16] : memref<256x128xbf16, #tpu.memory_space<vmem>>, vector<256x128xbf16>
      %cst_17 = arith.constant dense<0.000000e+00> : vector<128x128xf32>
      %24 = tpu.matmul %22, %23, %cst_17 {dimension_numbers = #tpu.dot_dimension_numbers<[1], [0], [0], [1], [0, 0, 1, 1], [], []>} : vector<128x256xbf16>, vector<256x128xbf16>, vector<128x128xf32> -> vector<128x128xf32>
      %c0_18 = arith.constant 0 : index
      %c0_19 = arith.constant 0 : index
      %25 = vector.load %arg6[%c0_18, %c0_19] : memref<1x128xf32, #tpu.memory_space<vmem>>, vector<1x128xf32>
      %26 = vector.broadcast %25 : vector<1x128xf32> to vector<128x128xf32>
      %27 = arith.addf %24, %26 : vector<128x128xf32>
      %cst_20 = arith.constant 0.000000e+00 : f32
      %28 = vector.broadcast %cst_20 : f32 to vector<128x128xf32>
      %29 = arith.maximumf %27, %28 : vector<128x128xf32>
      %30 = arith.truncf %29 : vector<128x128xf32> to vector<128x128xbf16>
      %c0_21 = arith.constant 0 : index
      %c0_22 = arith.constant 0 : index
      %31 = vector.load %arg7[%c0_21, %c0_22] : memref<128x128xbf16, #tpu.memory_space<vmem>>, vector<128x128xbf16>
      tpu.vector_store %arg7[%c0_21, %c0_22], %30 {strides = array<i32>} : memref<128x128xbf16, #tpu.memory_space<vmem>>, vector<128x128xbf16>,
    } else {
    }
    return
  }
  func.func @transform_0(%arg0: i32, %arg1: i32) -> (i32, i32) {
    %c0_i32 = arith.constant 0 : i32
    return %arg0, %arg1 : i32, i32
  }
  func.func @transform_1(%arg0: i32, %arg1: i32) -> (i32, i32) {
    %c0_i32 = arith.constant 0 : i32
    %c0_i32_0 = arith.constant 0 : i32
    %c0_i32_1 = arith.constant 0 : i32
    return %c0_i32, %c0_i32_0 : i32, i32
  }
  func.func @transform_2(%arg0: i32, %arg1: i32) -> (i32, i32) {
    %c0_i32 = arith.constant 0 : i32
    %c0_i32_0 = arith.constant 0 : i32
    return %arg0, %c0_i32 : i32, i32
  }
  func.func @transform_3(%arg0: i32, %arg1: i32) -> (i32, i32) {
    %c0_i32 = arith.constant 0 : i32
    %c0_i32_0 = arith.constant 0 : i32
    %c0_i32_1 = arith.constant 0 : i32
    return %c0_i32, %c0_i32_0 : i32, i32
  }
  func.func @transform_4(%arg0: i32, %arg1: i32) -> (i32, i32) {
    %c0_i32 = arith.constant 0 : i32
    %c0_i32_0 = arith.constant 0 : i32
    %c0_i32_1 = arith.constant 0 : i32
    return %c0_i32, %c0_i32_0 : i32, i32
  }
  func.func @transform_5(%arg0: i32, %arg1: i32) -> (i32, i32) {
    %c0_i32 = arith.constant 0 : i32
    %c0_i32_0 = arith.constant 0 : i32
    return %arg0, %c0_i32 : i32, i32
  }
}

module attributes {stable_mosaic.version = 11 : i64} {
  func.func @sage_layer_kernel(%arg0: i32, %arg1: i32, %arg2: memref<128x128xi8, #tpu.memory_space<vmem>>, %arg3: memref<128x128xbf16, #tpu.memory_space<vmem>>, %arg4: memref<128x1xf32, #tpu.memory_space<vmem>>, %arg5: memref<256x128xbf16, #tpu.memory_space<vmem>>, %arg6: memref<1x128xf32, #tpu.memory_space<vmem>>, %arg7: memref<128x128xf32, #tpu.memory_space<vmem>>, %arg8: memref<128x256xf32, #tpu.memory_space<vmem>>) attributes {dimension_semantics = [#tpu.dimension_semantics<parallel>, #tpu.dimension_semantics<arbitrary>], iteration_bounds = array<i64: 1, 1>, scalar_prefetch = 0 : i64, scratch_operands = 1 : i64, tpu.core_type = #tpu.core_type<tc>, window_params = [{transform_indices = @transform_0, window_bounds = array<i64: 128, 128>}, {pipeline_mode = #tpu.pipeline_mode<synchronous>, transform_indices = @transform_1, window_bounds = array<i64: 128, 128>}, {transform_indices = @transform_2, window_bounds = array<i64: 128, 1>}, {pipeline_mode = #tpu.pipeline_mode<synchronous>, transform_indices = @transform_3, window_bounds = array<i64: 256, 128>}, {pipeline_mode = #tpu.pipeline_mode<synchronous>, transform_indices = @transform_4, window_bounds = array<i64: 1, 128>}, {transform_indices = @transform_5, window_bounds = array<i64: 128, 128>}]} {
    %c128_i32 = arith.constant 128 : i32
    %0 = arith.muli %arg1, %c128_i32 : i32
    %1 = tpu.assume_multiple %0, 128 : i32
    %2 = arith.index_cast %1 : i32 to index
    %c0 = arith.constant 0 : index
    %3 = vector.load %arg3[%2, %c0] : memref<128x128xbf16, #tpu.memory_space<vmem>>, vector<128x128xbf16>
    %c0_0 = arith.constant 0 : index
    %c0_1 = arith.constant 0 : index
    %4 = vector.load %arg2[%c0_0, %c0_1] : memref<128x128xi8, #tpu.memory_space<vmem>>, vector<128x128xi8>
    %5 = arith.sitofp %4 : vector<128x128xi8> to vector<128x128xbf16>
    %cst = arith.constant dense<0.000000e+00> : vector<128x128xf32>
    %6 = tpu.matmul %5, %3, %cst {dimension_numbers = #tpu.dot_dimension_numbers<[1], [0], [0], [1], [0, 0, 1, 1], [], []>} : vector<128x128xbf16>, vector<128x128xbf16>, vector<128x128xf32> -> vector<128x128xf32>
    %c0_i32 = arith.constant 0 : i32
    %7 = arith.cmpi eq, %arg1, %c0_i32 : i32
    %8 = arith.extui %7 : i1 to i32
    %c0_i32_2 = arith.constant 0 : i32
    %9 = arith.cmpi ne, %8, %c0_i32_2 : i32
    scf.if %9 {
      %c0_7 = arith.constant 0 : index
      %c0_8 = arith.constant 0 : index
      %16 = vector.load %arg8[%c0_7, %c0_8] : memref<128x256xf32, #tpu.memory_space<vmem>>, vector<128x128xf32>
      tpu.vector_store %arg8[%c0_7, %c0_8], %6 {strides = array<i32>} : memref<128x256xf32, #tpu.memory_space<vmem>>, vector<128x128xf32>,
      %c128_i32_9 = arith.constant 128 : i32
      %17 = arith.muli %arg0, %c128_i32_9 : i32
      %18 = tpu.assume_multiple %17, 128 : i32
      %19 = arith.index_cast %18 : i32 to index
      %c0_10 = arith.constant 0 : index
      %20 = vector.load %arg3[%19, %c0_10] : memref<128x128xbf16, #tpu.memory_space<vmem>>, vector<128x128xbf16>
      %21 = arith.extf %20 : vector<128x128xbf16> to vector<128x128xf32>
      %c0_11 = arith.constant 0 : index
      %c128 = arith.constant 128 : index
      %22 = vector.load %arg8[%c0_11, %c128] : memref<128x256xf32, #tpu.memory_space<vmem>>, vector<128x128xf32>
      tpu.vector_store %arg8[%c0_11, %c128], %21 {strides = array<i32>} : memref<128x256xf32, #tpu.memory_space<vmem>>, vector<128x128xf32>,
    } else {
    }
    %c0_i32_3 = arith.constant 0 : i32
    %10 = arith.cmpi sgt, %arg1, %c0_i32_3 : i32
    %11 = arith.extui %10 : i1 to i32
    %c0_i32_4 = arith.constant 0 : i32
    %12 = arith.cmpi ne, %11, %c0_i32_4 : i32
    scf.if %12 {
      %c0_7 = arith.constant 0 : index
      %c0_8 = arith.constant 0 : index
      %16 = vector.load %arg8[%c0_7, %c0_8] : memref<128x256xf32, #tpu.memory_space<vmem>>, vector<128x128xf32>
      %17 = arith.addf %16, %6 : vector<128x128xf32>
      %c0_9 = arith.constant 0 : index
      %c0_10 = arith.constant 0 : index
      %18 = vector.load %arg8[%c0_9, %c0_10] : memref<128x256xf32, #tpu.memory_space<vmem>>, vector<128x128xf32>
      tpu.vector_store %arg8[%c0_9, %c0_10], %17 {strides = array<i32>} : memref<128x256xf32, #tpu.memory_space<vmem>>, vector<128x128xf32>,
    } else {
    }
    %c0_i32_5 = arith.constant 0 : i32
    %13 = arith.cmpi eq, %arg1, %c0_i32_5 : i32
    %14 = arith.extui %13 : i1 to i32
    %c0_i32_6 = arith.constant 0 : i32
    %15 = arith.cmpi ne, %14, %c0_i32_6 : i32
    scf.if %15 {
      %c0_7 = arith.constant 0 : index
      %c0_8 = arith.constant 0 : index
      %16 = vector.load %arg8[%c0_7, %c0_8] : memref<128x256xf32, #tpu.memory_space<vmem>>, vector<128x128xf32>
      %c0_9 = arith.constant 0 : index
      %c0_10 = arith.constant 0 : index
      %17 = vector.load %arg4[%c0_9, %c0_10] : memref<128x1xf32, #tpu.memory_space<vmem>>, vector<128x1xf32>
      %18 = vector.broadcast %17 : vector<128x1xf32> to vector<128x128xf32>
      %19 = arith.mulf %16, %18 : vector<128x128xf32>
      %c0_11 = arith.constant 0 : index
      %c0_12 = arith.constant 0 : index
      %20 = vector.load %arg8[%c0_11, %c0_12] : memref<128x256xf32, #tpu.memory_space<vmem>>, vector<128x128xf32>
      tpu.vector_store %arg8[%c0_11, %c0_12], %19 {strides = array<i32>} : memref<128x256xf32, #tpu.memory_space<vmem>>, vector<128x128xf32>,
      %c0_13 = arith.constant 0 : index
      %c0_14 = arith.constant 0 : index
      %21 = vector.load %arg8[%c0_13, %c0_14] : memref<128x256xf32, #tpu.memory_space<vmem>>, vector<128x256xf32>
      %22 = arith.truncf %21 : vector<128x256xf32> to vector<128x256xbf16>
      %c0_15 = arith.constant 0 : index
      %c0_16 = arith.constant 0 : index
      %23 = vector.load %arg5[%c0_15, %c0_16] : memref<256x128xbf16, #tpu.memory_space<vmem>>, vector<256x128xbf16>
      %cst_17 = arith.constant dense<0.000000e+00> : vector<128x128xf32>
      %24 = tpu.matmul %22, %23, %cst_17 {dimension_numbers = #tpu.dot_dimension_numbers<[1], [0], [0], [1], [0, 0, 1, 1], [], []>} : vector<128x256xbf16>, vector<256x128xbf16>, vector<128x128xf32> -> vector<128x128xf32>
      %c0_18 = arith.constant 0 : index
      %c0_19 = arith.constant 0 : index
      %25 = vector.load %arg6[%c0_18, %c0_19] : memref<1x128xf32, #tpu.memory_space<vmem>>, vector<1x128xf32>
      %26 = vector.broadcast %25 : vector<1x128xf32> to vector<128x128xf32>
      %27 = arith.addf %24, %26 : vector<128x128xf32>
      %c0_20 = arith.constant 0 : index
      %c0_21 = arith.constant 0 : index
      %28 = vector.load %arg7[%c0_20, %c0_21] : memref<128x128xf32, #tpu.memory_space<vmem>>, vector<128x128xf32>
      tpu.vector_store %arg7[%c0_20, %c0_21], %27 {strides = array<i32>} : memref<128x128xf32, #tpu.memory_space<vmem>>, vector<128x128xf32>,
    } else {
    }
    return
  }
  func.func @transform_0(%arg0: i32, %arg1: i32) -> (i32, i32) {
    %c0_i32 = arith.constant 0 : i32
    return %arg0, %arg1 : i32, i32
  }
  func.func @transform_1(%arg0: i32, %arg1: i32) -> (i32, i32) {
    %c0_i32 = arith.constant 0 : i32
    %c0_i32_0 = arith.constant 0 : i32
    %c0_i32_1 = arith.constant 0 : i32
    return %c0_i32, %c0_i32_0 : i32, i32
  }
  func.func @transform_2(%arg0: i32, %arg1: i32) -> (i32, i32) {
    %c0_i32 = arith.constant 0 : i32
    %c0_i32_0 = arith.constant 0 : i32
    return %arg0, %c0_i32 : i32, i32
  }
  func.func @transform_3(%arg0: i32, %arg1: i32) -> (i32, i32) {
    %c0_i32 = arith.constant 0 : i32
    %c0_i32_0 = arith.constant 0 : i32
    %c0_i32_1 = arith.constant 0 : i32
    return %c0_i32, %c0_i32_0 : i32, i32
  }
  func.func @transform_4(%arg0: i32, %arg1: i32) -> (i32, i32) {
    %c0_i32 = arith.constant 0 : i32
    %c0_i32_0 = arith.constant 0 : i32
    %c0_i32_1 = arith.constant 0 : i32
    return %c0_i32, %c0_i32_0 : i32, i32
  }
  func.func @transform_5(%arg0: i32, %arg1: i32) -> (i32, i32) {
    %c0_i32 = arith.constant 0 : i32
    %c0_i32_0 = arith.constant 0 : i32
    return %arg0, %c0_i32 : i32, i32
  }
}

</mosaic_0001>

<bundles_post_ra>
// kernel: width_gnn_encoder.3
= control target key start
LH: loop header
LB: loop body
LE: loop exit
PB: predicated region body
PF: predicated region fallthrough
CT: control target
= control target key end

     0   :  { %v1070_v1 = vmov 0   ;;  %s1362_s1 = inlined_call_operand.vmem [shape: bf16[128,128], index: 1, kind: input, shape index: {}]   ;;  %s1363_s0 = inlined_call_operand.vmem [shape: s8[128,128], index: 0, kind: input, shape index: {}]   ;;  %s1364_s2 = inlined_call_operand.vmem [shape: f32[128,1], index: 2, kind: input, shape index: {}]   ;;  %s1365_s3 = inlined_call_operand.vmem [shape: bf16[256,128], index: 3, kind: input, shape index: {}]   ;;  %s1366_s4 = inlined_call_operand.vmem [shape: f32[1,128], index: 4, kind: input, shape index: {}]   ;;  %s1367_s5 = inlined_call_operand.vmem [shape: f32[128,128], index: 5, kind: output, shape index: {}]  }
   0x1   :  { %v1046_v0 = vld [vmem:[%s1362_s1 + $0x38] sm:$0xff]   ;;  %1044 = vset.pattern.permute.xlu0 %v1070_v1  ;;  %1045 = vset.pattern.permute.xlu1 %v1070_v1  ;;  %v1047_v2 = vld [vmem:[%s1362_s1 + $0x30] sm:$0xff]   ;;  %v1048_v3 = vld [vmem:[%s1362_s1 + $0x28] sm:$0xff]  }
   0x2   :  { %995 = vmatprep.subr.bf16.mxu0 %v1046_v0  ;;  %v1049_v4 = vld [vmem:[%s1362_s1 + $0x20] sm:$0xff]   ;;  %v1050_v10 = vld [vmem:[%s1362_s1 + $0x18] sm:$0xff]   ;;  %v417_v12 = vld [vmem:[%s1364_s2 + $0x30] sm:$0xff] }
   0x3   :  { %996 = vmatpush3.bf16.msra.mxu0 %v1046_v0  ;;  %v42_v5 = vld [vmem:[%s1363_s0] sm:$0x3]  ;;  %v43_v6 = vld [vmem:[%s1363_s0 + $0x2] sm:$0x3]  ;;  %459 = vperm.xlu1 %1045, %v417_v12   ;;  %v416_v13 = vld [vmem:[%s1364_s2 + $0x28] sm:$0xff] }
   0x4   :  { %997 = vmatprep.subr.bf16.mxu0 %v1047_v2  ;;  %v58_v7 = vunpack.c.l.s8.bf16 %v42_v5  ;;  %v59_v8 = vunpack.c.l.s8.bf16 %v43_v6  ;;  %v415_v11 = vld [vmem:[%s1364_s2 + $0x20] sm:$0xff]  ;;  %v418_v14 = vld [vmem:[%s1364_s2 + $0x38] sm:$0xff]  ;;  %v1051_v15 = vld [vmem:[%s1362_s1 + $0x10] sm:$0xff]  }
   0x5   :  { %449 = vperm.xlu0 %1044, %v415_v11   ;;  %v419_v16 = vld [vmem:[%s1364_s2 + $0x40] sm:$0xff]  ;;  %v420_v17 = vld [vmem:[%s1364_s2 + $0x48] sm:$0xff]  ;;  %v1054_v18 = vld [vmem:[%s1365_s3 + $0x78] sm:$0xff]  }
   0x6   :  { %v843_v9 = vcombine.low %v58_v7, %v59_v8  ;;  %v1052_v19 = vld [vmem:[%s1362_s1 + $0x8] sm:$0xff]   ;;  %v44_v20 = vld [vmem:[%s1363_s0 + $0x4] sm:$0x3]  ;;  %v45_v21 = vld [vmem:[%s1363_s0 + $0x6] sm:$0x3]  ;;  %1027 = vmatprep.subr.bf16.mxu1 %v1054_v18 }
   0x7   :  { %998 = vmatpush3.bf16.msra.mxu0 %v1047_v2  ;;  %464 = vperm.xlu1 %1045, %v418_v14   ;;  %v421_v22 = vld [vmem:[%s1364_s2 + $0x50] sm:$0xff]  ;;  %v1055_v23 = vld [vmem:[%s1365_s3 + $0x38] sm:$0xff]   ;;  %v1053_v24 = vld [vmem:[%s1362_s1] sm:$0xff]   ;;  %v60_v31 = vunpack.c.l.s8.bf16 %v44_v20  ;;  %v61_v32 = vunpack.c.l.s8.bf16 %v45_v21 }
   0x8   :  { %999 = vmatprep.subr.bf16.mxu0 %v1048_v3  ;;  %1011 = vmatprep.mubr.bf16.mxu0 %v843_v9  ;;  %v46_v25 = vld [vmem:[%s1363_s0 + $0x8] sm:$0x3]  ;;  %v1056_v26 = vld [vmem:[%s1365_s3 + $0x70] sm:$0xff]   ;;  %v422_v27 = vld [vmem:[%s1364_s2 + $0x58] sm:$0xff] }
   0x9   :  { %454 = vperm.xlu0 %1044, %v416_v13   ;;  %1035 = vmatpush3.bf16.msra.mxu1 %v1055_v23  ;;  %v47_v28 = vld [vmem:[%s1363_s0 + $0xa] sm:$0x3]  ;;  %v411_v29 = vld [vmem:[%s1364_s2] sm:$0xff]  ;;  %v1057_v30 = vld [vmem:[%s1365_s3 + $0x30] sm:$0xff]   ;;  %v62_v34 = vunpack.c.l.s8.bf16 %v46_v25  ;;  %v844_v42 = vcombine.low %v60_v31, %v61_v32 }
   0xa   :  { %1028 = vmatprep.subr.bf16.mxu1 %v1056_v26  ;;  %v1058_v33 = vld [vmem:[%s1365_s3 + $0x68] sm:$0xff]   ;;  %v63_v35 = vunpack.c.l.s8.bf16 %v47_v28  ;;  %v423_v39 = vld [vmem:[%s1364_s2 + $0x60] sm:$0xff]  ;;  %v50_v43 = vld [vmem:[%s1363_s0 + $0x10] sm:$0x3] }
   0xb   :  { %1000 = vmatpush3.bf16.msra.mxu0 %v1048_v3  ;;  %474 = vperm.xlu1 %1045, %v420_v17   ;;  %v412_v36 = vld [vmem:[%s1364_s2 + $0x8] sm:$0xff]  ;;  %v1060_v41 = vld [vmem:[%s1365_s3 + $0x60] sm:$0xff]   ;;  %v51_v44 = vld [vmem:[%s1363_s0 + $0x12] sm:$0x3]  ;;  %v66_v50 = vunpack.c.l.s8.bf16 %v50_v43 }
   0xc   :  { %1001 = vmatprep.subr.bf16.mxu0 %v1049_v4  ;;  %v48_v37 = vld [vmem:[%s1363_s0 + $0xc] sm:$0x3]  ;;  %v49_v38 = vld [vmem:[%s1363_s0 + $0xe] sm:$0x3]  ;;  %v845_v46 = vcombine.low %v62_v34, %v63_v35  ;;  %v1061_v49 = vld [vmem:[%s1365_s3 + $0x20] sm:$0xff]   ;;  %v67_v51 = vunpack.c.l.s8.bf16 %v51_v44 }
   0xd   :  { %469 = vperm.xlu0 %1044, %v419_v16   ;;  %1036 = vmatpush3.bf16.msra.mxu1 %v1057_v30  ;;  %v1059_v40 = vld [vmem:[%s1365_s3 + $0x28] sm:$0xff]   ;;  %v64_v47 = vunpack.c.l.s8.bf16 %v48_v37  ;;  %v65_v48 = vunpack.c.l.s8.bf16 %v49_v38  ;;  %v413_v52 = vld [vmem:[%s1364_s2 + $0x10] sm:$0xff]  ;;  %v1062_v53 = vld [vmem:[%s1365_s3 + $0x58] sm:$0xff]  }
   0xe   :  { %1029 = vmatprep.subr.bf16.mxu1 %v1058_v33  ;;  %v424_v45 = vld [vmem:[%s1364_s2 + $0x68] sm:$0xff]  ;;  %v414_v54 = vld [vmem:[%s1364_s2 + $0x18] sm:$0xff]  ;;  %v52_v56 = vld [vmem:[%s1363_s0 + $0x14] sm:$0x3]  ;;  %v847_v58 = vcombine.low %v66_v50, %v67_v51 }
   0xf   :  { %1002 = vmatpush3.bf16.msra.mxu0 %v1049_v4  ;;  %484 = vperm.xlu1 %1045, %v422_v27   ;;  %v846_v55 = vcombine.low %v64_v47, %v65_v48  ;;  %v1063_v57 = vld [vmem:[%s1365_s3 + $0x18] sm:$0xff]   ;;  %v53_v59 = vld [vmem:[%s1363_s0 + $0x16] sm:$0x3]  ;;  %v68_v1 = vunpack.c.l.s8.bf16 %v52_v56  ;;  %v1066_v13 = vld [vmem:[%s1365_s3 + $0x48] sm:$0xff]  }
  0x10   :  { %1003 = vmatprep.subr.bf16.mxu0 %v1050_v10  ;;  %v425_v60 = vld [vmem:[%s1364_s2 + $0x70] sm:$0xff]  ;;  %v54_v62 = vld [vmem:[%s1363_s0 + $0x18] sm:$0x3]  ;;  %v55_v63 = vld [vmem:[%s1363_s0 + $0x1a] sm:$0x3]  ;;  %v69_v2 = vunpack.c.l.s8.bf16 %v53_v59 }
  0x11   :  { %479 = vperm.xlu0 %1044, %v421_v22   ;;  %1037 = vmatpush3.bf16.msra.mxu1 %v1059_v40  ;;  %v1064_v61 = vld [vmem:[%s1365_s3 + $0x50] sm:$0xff]   ;;  %v426_v0 = vld [vmem:[%s1364_s2 + $0x78] sm:$0xff]  ;;  %v70_v3 = vunpack.c.l.s8.bf16 %v54_v62  ;;  %v71_v4 = vunpack.c.l.s8.bf16 %v55_v63  ;;  %v1067_v14 = vld [vmem:[%s1365_s3 + $0x8] sm:$0xff]  }
  0x12   :  { %1030 = vmatprep.subr.bf16.mxu1 %v1060_v41  ;;  %v848_v5 = vcombine.low %v68_v1, %v69_v2  ;;  %v56_v7 = vld [vmem:[%s1363_s0 + $0x1c] sm:$0x3]  ;;  %v57_v8 = vld [vmem:[%s1363_s0 + $0x1e] sm:$0x3]  ;;  %v1065_v12 = vld [vmem:[%s1365_s3 + $0x10] sm:$0xff]  }
  0x13   :  { %1004 = vmatpush3.bf16.msra.mxu0 %v1050_v10  ;;  %434 = vperm.xlu1 %1045, %v412_v36   ;;  %v849_v6 = vcombine.low %v70_v3, %v71_v4  ;;  %v72_v9 = vunpack.c.l.s8.bf16 %v56_v7  ;;  %v73_v10 = vunpack.c.l.s8.bf16 %v57_v8  ;;  %v1069_v16 = vld [vmem:[%s1365_s3] sm:$0xff]  }
  0x14   :  { %1005 = vmatprep.subr.bf16.mxu0 %v1051_v15  ;;  %v877_v17 = vld [vmem:[%s1362_s1] sm:$0xff]  }
  0x15   :  { %429 = vperm.xlu0 %1044, %v411_v29   ;;  %1038 = vmatpush3.bf16.msra.mxu1 %v1061_v49  ;;  %v850_v11 = vcombine.low %v72_v9, %v73_v10 }
  0x16   :  { %1031 = vmatprep.subr.bf16.mxu1 %v1062_v53 }
  0x17   :  { %1006 = vmatpush3.bf16.msra.mxu0 %v1051_v15  ;;  %494 = vperm.xlu1 %1045, %v424_v45   ;;  %v1068_v15 = vld [vmem:[%s1365_s3 + $0x40] sm:$0xff]  }
  0x18   :  { %1007 = vmatprep.subr.bf16.mxu0 %v1052_v19 }
  0x19   :  { %489 = vperm.xlu0 %1044, %v423_v39   ;;  %1039 = vmatpush3.bf16.msra.mxu1 %v1063_v57  ;;  %v908_v39 = vld [vmem:[%s1362_s1 + $0x8] sm:$0xff]  }
  0x1a   :  { %1032 = vmatprep.subr.bf16.mxu1 %v1064_v61 }
  0x1b   :  { %1008 = vmatpush3.bf16.msra.mxu0 %v1052_v19  ;;  %444 = vperm.xlu1 %1045, %v414_v54  }
  0x1c   :  { %1009 = vmatprep.subr.bf16.mxu0 %v1053_v24 }
  0x1d   :  { %439 = vperm.xlu0 %1044, %v413_v52   ;;  %1040 = vmatpush3.bf16.msra.mxu1 %v1065_v12  ;;  %v910_v52 = vld [vmem:[%s1362_s1 + $0x18] sm:$0xff]  }
  0x1e   :  { %1033 = vmatprep.subr.bf16.mxu1 %v1066_v13 }
  0x1f   :  { %1010 = vmatpush3.bf16.msra.mxu0 %v1053_v24  ;;  %504 = vperm.xlu1 %1045, %v426_v0   ;;  %v912_v0 = vld [vmem:[%s1362_s1 + $0x28] sm:$0xff]  }
  0x20   :  { %931 = vmatprep.subr.bf16.mxu0 %v1054_v18  ;;  %v909_v18 = vld [vmem:[%s1362_s1 + $0x10] sm:$0xff]  }
  0x21   :  { %499 = vperm.xlu0 %1044, %v425_v60   ;;  %1041 = vmatpush3.bf16.msra.mxu1 %v1067_v14 }
  0x22   :  { %1012 = vmatmul.mubr.bf16.vlgmr.msra.gmra.mxu0 %v844_v42  ;;  %1034 = vmatprep.subr.bf16.mxu1 %v1068_v15 }
  0x23   :  { %1015 = vmatprep.mubr.bf16.mxu0 %v845_v46  ;;  %932 = vmatpush3.bf16.msra.mxu0 %v1055_v23 }
  0x24   :  { %933 = vmatprep.subr.bf16.mxu0 %v1056_v26  ;;  %770 = vmatprep.mubr.bf16.mxu1 %v909_v18  ;;  %v1296_v18 = vld [vmem:[%s1366_s4] ss:$0 sm:$0xff] }
  0x25   :  { %1042 = vmatpush3.bf16.msra.mxu1 %v1069_v16 }
  0x27   :  { %934 = vmatpush3.bf16.msra.mxu0 %v1057_v30 }
  0x28   :  { %935 = vmatprep.subr.bf16.mxu0 %v1058_v33 }
  0x2a   :  { %1016 = vmatmul.mubr.bf16.gmra.mxu0 %v846_v55 }
  0x2b   :  { %1019 = vmatprep.mubr.bf16.mxu0 %v847_v58  ;;  %936 = vmatpush3.bf16.msra.mxu0 %v1059_v40  ;;  %v911_v58 = vld [vmem:[%s1362_s1 + $0x20] sm:$0xff]  }
  0x2c   :  { %937 = vmatprep.subr.bf16.mxu0 %v1060_v41 }
  0x2f   :  { %938 = vmatpush3.bf16.msra.mxu0 %v1061_v49 }
  0x30   :  { %939 = vmatprep.subr.bf16.mxu0 %v1062_v53 }
  0x32   :  { %1020 = vmatmul.mubr.bf16.gmra.mxu0 %v848_v5 }
  0x33   :  { %1023 = vmatprep.mubr.bf16.mxu0 %v849_v6  ;;  %940 = vmatpush3.bf16.msra.mxu0 %v1063_v57  ;;  %v913_v6 = vld [vmem:[%s1362_s1 + $0x30] sm:$0xff]  }
  0x34   :  { %941 = vmatprep.subr.bf16.mxu0 %v1064_v61 }
  0x37   :  { %942 = vmatpush3.bf16.msra.mxu0 %v1065_v12 }
  0x38   :  { %943 = vmatprep.subr.bf16.mxu0 %v1066_v13 }
  0x3a   :  { %1024 = vmatmul.mubr.bf16.gmra.mxu0 %v850_v11  ;;  %v914_v11 = vld [vmem:[%s1362_s1 + $0x38] sm:$0xff]  }
  0x3b   :  { %944 = vmatpush3.bf16.msra.mxu0 %v1067_v14  ;;  %754 = vmatprep.mubr.bf16.mxu0 %v877_v17 }
  0x3c   :  { %945 = vmatprep.subr.bf16.mxu0 %v1068_v15 }
  0x3f   :  { %946 = vmatpush3.bf16.msra.mxu0 %v1069_v16 }
  0x7e   :  { %v460_v19 = vpop.permute.xlu1 %459 }
  0x80   :  { %v450_v20 = vpop.permute.xlu0 %449 }
  0x82   :  { %v465_v21 = vpop.permute.xlu1 %464 }
  0x84   :  { %v455_v22 = vpop.permute.xlu0 %454 }
  0x86   :  { %v475_v23 = vpop.permute.xlu1 %474 }
  0x88   :  { %v470_v24 = vpop.permute.xlu0 %469 }
  0x8a   :  { %v485_v25 = vpop.permute.xlu1 %484 }
  0x8c   :  { %v480_v26 = vpop.permute.xlu0 %479 }
  0x8e   :  { %v435_v27 = vpop.permute.xlu1 %434 }
  0x90   :  { %v430_v28 = vpop.permute.xlu0 %429 }
  0x92   :  { %v495_v31 = vpop.permute.xlu1 %494 }
  0x94   :  { %v490_v33 = vpop.permute.xlu0 %489 }
  0x96   :  { %v445_v40 = vpop.permute.xlu1 %444 }
  0x98   :  { %v440_v42 = vpop.permute.xlu0 %439 }
  0x9a   :  { %v505_v12 = vpop.permute.xlu1 %504 }
  0x9c   :  { %v500_v14 = vpop.permute.xlu0 %499 }
  0xe2   :  { %v1013_v29 = vpop.f32.mrf.mxu0 }
  0xe3   :  { %v509_v46 = vmul.f32 %v1013_v29, %v440_v42 }
  0xe4   :  { %v204_v30 = vpop.f32.mrf.mxu0 }
  0xe5   :  { %v507_v35 = vmul.f32 %v430_v28, %v204_v30 }
  0xe6   :  { %v1014_v32 = vpop.f32.mrf.mxu0 }
  0xe7   :  { %v510_v44 = vmul.f32 %v1014_v32, %v445_v40 }
  0xe8   :  { %v207_v34 = vpop.f32.mrf.mxu0 }
  0xe9   :  { %v508_v36 = vmul.f32 %v435_v27, %v207_v34  ;;  %v573_v50 = vpack.c.bf16 %v510_v44, %v509_v46 }
  0xea   :  { %v1017_v37 = vpop.f32.mrf.mxu0 }
  0xeb   :  { %v571_v38 = vpack.c.bf16 %v508_v36, %v507_v35  ;;  %v513_v56 = vmul.f32 %v1017_v37, %v460_v19 }
  0xec   :  { %v220_v41 = vpop.f32.mrf.mxu0 }
  0xed   :  { %755 = vmatmul.mubr.bf16.vlgmr.msra.gmra.mxu0 %v571_v38  ;;  %v511_v47 = vmul.f32 %v450_v20, %v220_v41 }
  0xee   :  { %v1018_v43 = vpop.f32.mrf.mxu0  ;;  %762 = vmatprep.mubr.bf16.mxu0 %v908_v39 }
  0xef   :  { %v514_v54 = vmul.f32 %v1018_v43, %v465_v21 }
  0xf0   :  { %v223_v45 = vpop.f32.mrf.mxu0 }
  0xf1   :  { %v512_v48 = vmul.f32 %v455_v22, %v223_v45  ;;  %v577_v57 = vpack.c.bf16 %v514_v54, %v513_v56 }
  0xf2   :  { %v1021_v49 = vpop.f32.mrf.mxu0 }
  0xf3   :  { %v575_v51 = vpack.c.bf16 %v512_v48, %v511_v47  ;;  %v517_v4 = vmul.f32 %v1021_v49, %v480_v26 }
  0xf4   :  { %v236_v53 = vpop.f32.mrf.mxu0 }
  0xf5   :  { %763 = vmatmul.mubr.bf16.gmra.mxu0 %v573_v50  ;;  %771 = vmatmul.mubr.bf16.vlgmr.msra.gmra.mxu1 %v575_v51  ;;  %v515_v62 = vmul.f32 %v470_v24, %v236_v53 }
  0xf6   :  { %778 = vmatprep.mubr.bf16.mxu1 %v910_v52  ;;  %v1022_v55 = vpop.f32.mrf.mxu0 }
  0xf7   :  { %v518_v2 = vmul.f32 %v1022_v55, %v485_v25 }
  0xf8   :  { %v239_v59 = vpop.f32.mrf.mxu0 }
  0xf9   :  { %v516_v60 = vmul.f32 %v475_v23, %v239_v59  ;;  %v581_v5 = vpack.c.bf16 %v518_v2, %v517_v4 }
  0xfa   :  { %v1025_v61 = vpop.f32.mrf.mxu0 }
  0xfb   :  { %v579_v63 = vpack.c.bf16 %v516_v60, %v515_v62  ;;  %v521_v15 = vmul.f32 %v1025_v61, %v500_v14 }
  0xfc   :  { %v252_v1 = vpop.f32.mrf.mxu0 }
  0xfd   :  { %779 = vmatmul.mubr.bf16.gmra.mxu1 %v577_v57  ;;  %v519_v9 = vmul.f32 %v490_v33, %v252_v1 }
  0xfe   :  { %786 = vmatprep.mubr.bf16.mxu1 %v911_v58  ;;  %v1026_v3 = vpop.f32.mrf.mxu0 }
  0xff   :  { %v522_v13 = vmul.f32 %v1026_v3, %v505_v12 }
 0x100   :  { %v255_v7 = vpop.f32.mrf.mxu0 }
 0x101   :  { %v520_v8 = vmul.f32 %v495_v31, %v255_v7  ;;  %v585_v16 = vpack.c.bf16 %v522_v13, %v521_v15 }
 0x103   :  { %v583_v10 = vpack.c.bf16 %v520_v8, %v519_v9 }
 0x105   :  { %787 = vmatmul.mubr.bf16.gmra.mxu1 %v579_v63 }
 0x106   :  { %794 = vmatprep.mubr.bf16.mxu1 %v912_v0 }
 0x10d   :  { %795 = vmatmul.mubr.bf16.gmra.mxu1 %v581_v5 }
 0x10e   :  { %802 = vmatprep.mubr.bf16.mxu1 %v913_v6 }
 0x115   :  { %803 = vmatmul.mubr.bf16.gmra.mxu1 %v583_v10 }
 0x116   :  { %810 = vmatprep.mubr.bf16.mxu1 %v914_v11 }
 0x11d   :  { %811 = vmatmul.mubr.bf16.gmra.mxu1 %v585_v16 }
 0x1ad   :  { %v947_v17 = vpop.f32.mrf.mxu0 }
 0x1af   :  { %v948_v19 = vpop.f32.mrf.mxu0 }
 0x1b0   :  { %v949_v20 = vadd.f32 %v948_v19, %v947_v17 }
 0x1b1   :  { %v950_v21 = vpop.f32.mrf.mxu0 }
 0x1b2   :  { %v757_v22 = vadd.f32 %v949_v20, %v1296_v18 }
 0x1b3   :  { %v951_v23 = vpop.f32.mrf.mxu0 }
 0x1b4   :  { %819 = vst [vmem:[%s1367_s5] sm:$0xff] %v757_v22  ;;  %v952_v24 = vadd.f32 %v951_v23, %v950_v21 }
 0x1b5   :  { %v953_v25 = vpop.f32.mrf.mxu0  ;;  %v959_v26 = vpop.f32.mrf.mxu1 }
 0x1b6   :  { %v760_v27 = vadd.f32 %v952_v24, %v1296_v18 }
 0x1b7   :  { %v954_v28 = vpop.f32.mrf.mxu0  ;;  %v960_v29 = vpop.f32.mrf.mxu1 }
 0x1b8   :  { %820 = vst [vmem:[%s1367_s5 + $0x8] sm:$0xff] %v760_v27  ;;  %v955_v30 = vadd.f32 %v954_v28, %v953_v25  ;;  %v961_v31 = vadd.f32 %v960_v29, %v959_v26 }
 0x1b9   :  { %v956_v32 = vpop.f32.mrf.mxu0  ;;  %v962_v33 = vpop.f32.mrf.mxu1 }
 0x1ba   :  { %v765_v34 = vadd.f32 %v955_v30, %v1296_v18  ;;  %v773_v35 = vadd.f32 %v961_v31, %v1296_v18 }
 0x1bb   :  { %v957_v36 = vpop.f32.mrf.mxu0  ;;  %v963_v37 = vpop.f32.mrf.mxu1 }
 0x1bc   :  { %821 = vst [vmem:[%s1367_s5 + $0x10] sm:$0xff] %v765_v34  ;;  %823 = vst [vmem:[%s1367_s5 + $0x20] sm:$0xff] %v773_v35  ;;  %v958_v38 = vadd.f32 %v957_v36, %v956_v32  ;;  %v964_v39 = vadd.f32 %v963_v37, %v962_v33 }
 0x1bd   :  { %v965_v40 = vpop.f32.mrf.mxu1 }
 0x1be   :  { %v768_v41 = vadd.f32 %v958_v38, %v1296_v18  ;;  %v776_v42 = vadd.f32 %v964_v39, %v1296_v18 }
 0x1bf   :  { %v966_v43 = vpop.f32.mrf.mxu1 }
 0x1c0   :  { %822 = vst [vmem:[%s1367_s5 + $0x18] sm:$0xff] %v768_v41  ;;  %824 = vst [vmem:[%s1367_s5 + $0x28] sm:$0xff] %v776_v42  ;;  %v967_v44 = vadd.f32 %v966_v43, %v965_v40 }
 0x1c1   :  { %v968_v45 = vpop.f32.mrf.mxu1 }
 0x1c2   :  { %v781_v46 = vadd.f32 %v967_v44, %v1296_v18 }
 0x1c3   :  { %v969_v47 = vpop.f32.mrf.mxu1 }
 0x1c4   :  { %825 = vst [vmem:[%s1367_s5 + $0x30] sm:$0xff] %v781_v46  ;;  %v970_v48 = vadd.f32 %v969_v47, %v968_v45 }
 0x1c5   :  { %v971_v49 = vpop.f32.mrf.mxu1 }
 0x1c6   :  { %v784_v50 = vadd.f32 %v970_v48, %v1296_v18 }
 0x1c7   :  { %v972_v51 = vpop.f32.mrf.mxu1 }
 0x1c8   :  { %826 = vst [vmem:[%s1367_s5 + $0x38] sm:$0xff] %v784_v50  ;;  %v973_v52 = vadd.f32 %v972_v51, %v971_v49 }
 0x1c9   :  { %v974_v53 = vpop.f32.mrf.mxu1 }
 0x1ca   :  { %v789_v54 = vadd.f32 %v973_v52, %v1296_v18 }
 0x1cb   :  { %v975_v55 = vpop.f32.mrf.mxu1 }
 0x1cc   :  { %827 = vst [vmem:[%s1367_s5 + $0x40] sm:$0xff] %v789_v54  ;;  %v976_v56 = vadd.f32 %v975_v55, %v974_v53 }
 0x1cd   :  { %v977_v57 = vpop.f32.mrf.mxu1 }
 0x1ce   :  { %v792_v58 = vadd.f32 %v976_v56, %v1296_v18 }
 0x1cf   :  { %v978_v59 = vpop.f32.mrf.mxu1 }
 0x1d0   :  { %828 = vst [vmem:[%s1367_s5 + $0x48] sm:$0xff] %v792_v58  ;;  %v979_v60 = vadd.f32 %v978_v59, %v977_v57 }
 0x1d1   :  { %v980_v61 = vpop.f32.mrf.mxu1 }
 0x1d2   :  { %v797_v62 = vadd.f32 %v979_v60, %v1296_v18 }
 0x1d3   :  { %v981_v63 = vpop.f32.mrf.mxu1 }
 0x1d4   :  { %829 = vst [vmem:[%s1367_s5 + $0x50] sm:$0xff] %v797_v62  ;;  %v982_v0 = vadd.f32 %v981_v63, %v980_v61 }
 0x1d5   :  { %v983_v1 = vpop.f32.mrf.mxu1 }
 0x1d6   :  { %v800_v2 = vadd.f32 %v982_v0, %v1296_v18 }
 0x1d7   :  { %v984_v3 = vpop.f32.mrf.mxu1 }
 0x1d8   :  { %830 = vst [vmem:[%s1367_s5 + $0x58] sm:$0xff] %v800_v2  ;;  %v985_v4 = vadd.f32 %v984_v3, %v983_v1 }
 0x1d9   :  { %v986_v5 = vpop.f32.mrf.mxu1 }
 0x1da   :  { %v805_v6 = vadd.f32 %v985_v4, %v1296_v18 }
 0x1db   :  { %v987_v7 = vpop.f32.mrf.mxu1 }
 0x1dc   :  { %831 = vst [vmem:[%s1367_s5 + $0x60] sm:$0xff] %v805_v6  ;;  %v988_v8 = vadd.f32 %v987_v7, %v986_v5 }
 0x1dd   :  { %v989_v9 = vpop.f32.mrf.mxu1 }
 0x1de   :  { %v808_v10 = vadd.f32 %v988_v8, %v1296_v18 }
 0x1df   :  { %v990_v11 = vpop.f32.mrf.mxu1 }
 0x1e0   :  { %832 = vst [vmem:[%s1367_s5 + $0x68] sm:$0xff] %v808_v10  ;;  %v991_v12 = vadd.f32 %v990_v11, %v989_v9 }
 0x1e1   :  { %v992_v13 = vpop.f32.mrf.mxu1 }
 0x1e2   :  { %v813_v14 = vadd.f32 %v991_v12, %v1296_v18 }
 0x1e3   :  { %v993_v15 = vpop.f32.mrf.mxu1 }
 0x1e4   :  { %833 = vst [vmem:[%s1367_s5 + $0x70] sm:$0xff] %v813_v14  ;;  %v994_v16 = vadd.f32 %v993_v15, %v992_v13 }
 0x1e6   :  { %v816_v17 = vadd.f32 %v994_v16, %v1296_v18 }
 0x1e8   :  { %834 = vst [vmem:[%s1367_s5 + $0x78] sm:$0xff] %v816_v17 }

// kernel: width_gnn_encoder.2
= control target key start
LH: loop header
LB: loop body
LE: loop exit
PB: predicated region body
PF: predicated region fallthrough
CT: control target
= control target key end

     0   :  { %v1229_v1 = vmov 0   ;;  %s1497_s1 = inlined_call_operand.vmem [shape: bf16[128,128], index: 1, kind: input, shape index: {}]   ;;  %s1498_s0 = inlined_call_operand.vmem [shape: s8[128,128], index: 0, kind: input, shape index: {}]   ;;  %s1499_s2 = inlined_call_operand.vmem [shape: f32[128,1], index: 2, kind: input, shape index: {}]   ;;  %s1500_s3 = inlined_call_operand.vmem [shape: bf16[256,128], index: 3, kind: input, shape index: {}]   ;;  %s1501_s4 = inlined_call_operand.vmem [shape: f32[1,128], index: 4, kind: input, shape index: {}]   ;;  %s1502_s5 = inlined_call_operand.vmem [shape: bf16[128,128], index: 5, kind: output, shape index: {}]  }
   0x1   :  { %v1205_v0 = vld [vmem:[%s1497_s1 + $0x38] sm:$0xff]   ;;  %1203 = vset.pattern.permute.xlu0 %v1229_v1  ;;  %1204 = vset.pattern.permute.xlu1 %v1229_v1  ;;  %v1206_v2 = vld [vmem:[%s1497_s1 + $0x30] sm:$0xff]   ;;  %v1207_v3 = vld [vmem:[%s1497_s1 + $0x28] sm:$0xff]  }
   0x2   :  { %1154 = vmatprep.subr.bf16.mxu0 %v1205_v0  ;;  %v1208_v4 = vld [vmem:[%s1497_s1 + $0x20] sm:$0xff]   ;;  %v1209_v10 = vld [vmem:[%s1497_s1 + $0x18] sm:$0xff]   ;;  %v417_v12 = vld [vmem:[%s1499_s2 + $0x30] sm:$0xff] }
   0x3   :  { %1155 = vmatpush3.bf16.msra.mxu0 %v1205_v0  ;;  %v42_v5 = vld [vmem:[%s1498_s0] sm:$0x3]  ;;  %v43_v6 = vld [vmem:[%s1498_s0 + $0x2] sm:$0x3]  ;;  %459 = vperm.xlu1 %1204, %v417_v12   ;;  %v416_v13 = vld [vmem:[%s1499_s2 + $0x28] sm:$0xff] }
   0x4   :  { %1156 = vmatprep.subr.bf16.mxu0 %v1206_v2  ;;  %v58_v7 = vunpack.c.l.s8.bf16 %v42_v5  ;;  %v59_v8 = vunpack.c.l.s8.bf16 %v43_v6  ;;  %v415_v11 = vld [vmem:[%s1499_s2 + $0x20] sm:$0xff]  ;;  %v418_v14 = vld [vmem:[%s1499_s2 + $0x38] sm:$0xff]  ;;  %v1210_v15 = vld [vmem:[%s1497_s1 + $0x10] sm:$0xff]  }
   0x5   :  { %449 = vperm.xlu0 %1203, %v415_v11   ;;  %v419_v16 = vld [vmem:[%s1499_s2 + $0x40] sm:$0xff]  ;;  %v420_v17 = vld [vmem:[%s1499_s2 + $0x48] sm:$0xff]  ;;  %v1213_v18 = vld [vmem:[%s1500_s3 + $0x78] sm:$0xff]  }
   0x6   :  { %v923_v9 = vcombine.low %v58_v7, %v59_v8  ;;  %v1211_v19 = vld [vmem:[%s1497_s1 + $0x8] sm:$0xff]   ;;  %v44_v20 = vld [vmem:[%s1498_s0 + $0x4] sm:$0x3]  ;;  %v45_v21 = vld [vmem:[%s1498_s0 + $0x6] sm:$0x3]  ;;  %1186 = vmatprep.subr.bf16.mxu1 %v1213_v18 }
   0x7   :  { %1157 = vmatpush3.bf16.msra.mxu0 %v1206_v2  ;;  %464 = vperm.xlu1 %1204, %v418_v14   ;;  %v421_v22 = vld [vmem:[%s1499_s2 + $0x50] sm:$0xff]  ;;  %v1214_v23 = vld [vmem:[%s1500_s3 + $0x38] sm:$0xff]   ;;  %v1212_v24 = vld [vmem:[%s1497_s1] sm:$0xff]   ;;  %v60_v31 = vunpack.c.l.s8.bf16 %v44_v20  ;;  %v61_v32 = vunpack.c.l.s8.bf16 %v45_v21 }
   0x8   :  { %1158 = vmatprep.subr.bf16.mxu0 %v1207_v3  ;;  %1170 = vmatprep.mubr.bf16.mxu0 %v923_v9  ;;  %v46_v25 = vld [vmem:[%s1498_s0 + $0x8] sm:$0x3]  ;;  %v1215_v26 = vld [vmem:[%s1500_s3 + $0x70] sm:$0xff]   ;;  %v422_v27 = vld [vmem:[%s1499_s2 + $0x58] sm:$0xff] }
   0x9   :  { %454 = vperm.xlu0 %1203, %v416_v13   ;;  %1194 = vmatpush3.bf16.msra.mxu1 %v1214_v23  ;;  %v47_v28 = vld [vmem:[%s1498_s0 + $0xa] sm:$0x3]  ;;  %v411_v29 = vld [vmem:[%s1499_s2] sm:$0xff]  ;;  %v1216_v30 = vld [vmem:[%s1500_s3 + $0x30] sm:$0xff]   ;;  %v62_v34 = vunpack.c.l.s8.bf16 %v46_v25  ;;  %v924_v42 = vcombine.low %v60_v31, %v61_v32 }
   0xa   :  { %1187 = vmatprep.subr.bf16.mxu1 %v1215_v26  ;;  %v1217_v33 = vld [vmem:[%s1500_s3 + $0x68] sm:$0xff]   ;;  %v63_v35 = vunpack.c.l.s8.bf16 %v47_v28  ;;  %v423_v39 = vld [vmem:[%s1499_s2 + $0x60] sm:$0xff]  ;;  %v50_v43 = vld [vmem:[%s1498_s0 + $0x10] sm:$0x3] }
   0xb   :  { %1159 = vmatpush3.bf16.msra.mxu0 %v1207_v3  ;;  %474 = vperm.xlu1 %1204, %v420_v17   ;;  %v412_v36 = vld [vmem:[%s1499_s2 + $0x8] sm:$0xff]  ;;  %v1219_v41 = vld [vmem:[%s1500_s3 + $0x60] sm:$0xff]   ;;  %v51_v44 = vld [vmem:[%s1498_s0 + $0x12] sm:$0x3]  ;;  %v66_v50 = vunpack.c.l.s8.bf16 %v50_v43 }
   0xc   :  { %1160 = vmatprep.subr.bf16.mxu0 %v1208_v4  ;;  %v48_v37 = vld [vmem:[%s1498_s0 + $0xc] sm:$0x3]  ;;  %v49_v38 = vld [vmem:[%s1498_s0 + $0xe] sm:$0x3]  ;;  %v925_v46 = vcombine.low %v62_v34, %v63_v35  ;;  %v1220_v49 = vld [vmem:[%s1500_s3 + $0x20] sm:$0xff]   ;;  %v67_v51 = vunpack.c.l.s8.bf16 %v51_v44 }
   0xd   :  { %469 = vperm.xlu0 %1203, %v419_v16   ;;  %1195 = vmatpush3.bf16.msra.mxu1 %v1216_v30  ;;  %v1218_v40 = vld [vmem:[%s1500_s3 + $0x28] sm:$0xff]   ;;  %v64_v47 = vunpack.c.l.s8.bf16 %v48_v37  ;;  %v65_v48 = vunpack.c.l.s8.bf16 %v49_v38  ;;  %v413_v52 = vld [vmem:[%s1499_s2 + $0x10] sm:$0xff]  ;;  %v1221_v53 = vld [vmem:[%s1500_s3 + $0x58] sm:$0xff]  }
   0xe   :  { %1188 = vmatprep.subr.bf16.mxu1 %v1217_v33  ;;  %v424_v45 = vld [vmem:[%s1499_s2 + $0x68] sm:$0xff]  ;;  %v414_v54 = vld [vmem:[%s1499_s2 + $0x18] sm:$0xff]  ;;  %v52_v56 = vld [vmem:[%s1498_s0 + $0x14] sm:$0x3]  ;;  %v927_v58 = vcombine.low %v66_v50, %v67_v51 }
   0xf   :  { %1161 = vmatpush3.bf16.msra.mxu0 %v1208_v4  ;;  %484 = vperm.xlu1 %1204, %v422_v27   ;;  %v926_v55 = vcombine.low %v64_v47, %v65_v48  ;;  %v1222_v57 = vld [vmem:[%s1500_s3 + $0x18] sm:$0xff]   ;;  %v53_v59 = vld [vmem:[%s1498_s0 + $0x16] sm:$0x3]  ;;  %v68_v1 = vunpack.c.l.s8.bf16 %v52_v56  ;;  %v1225_v13 = vld [vmem:[%s1500_s3 + $0x48] sm:$0xff]  }
  0x10   :  { %1162 = vmatprep.subr.bf16.mxu0 %v1209_v10  ;;  %v425_v60 = vld [vmem:[%s1499_s2 + $0x70] sm:$0xff]  ;;  %v54_v62 = vld [vmem:[%s1498_s0 + $0x18] sm:$0x3]  ;;  %v55_v63 = vld [vmem:[%s1498_s0 + $0x1a] sm:$0x3]  ;;  %v69_v2 = vunpack.c.l.s8.bf16 %v53_v59 }
  0x11   :  { %479 = vperm.xlu0 %1203, %v421_v22   ;;  %1196 = vmatpush3.bf16.msra.mxu1 %v1218_v40  ;;  %v1223_v61 = vld [vmem:[%s1500_s3 + $0x50] sm:$0xff]   ;;  %v426_v0 = vld [vmem:[%s1499_s2 + $0x78] sm:$0xff]  ;;  %v70_v3 = vunpack.c.l.s8.bf16 %v54_v62  ;;  %v71_v4 = vunpack.c.l.s8.bf16 %v55_v63  ;;  %v1226_v14 = vld [vmem:[%s1500_s3 + $0x8] sm:$0xff]  }
  0x12   :  { %1189 = vmatprep.subr.bf16.mxu1 %v1219_v41  ;;  %v928_v5 = vcombine.low %v68_v1, %v69_v2  ;;  %v56_v7 = vld [vmem:[%s1498_s0 + $0x1c] sm:$0x3]  ;;  %v57_v8 = vld [vmem:[%s1498_s0 + $0x1e] sm:$0x3]  ;;  %v1224_v12 = vld [vmem:[%s1500_s3 + $0x10] sm:$0xff]  }
  0x13   :  { %1163 = vmatpush3.bf16.msra.mxu0 %v1209_v10  ;;  %434 = vperm.xlu1 %1204, %v412_v36   ;;  %v929_v6 = vcombine.low %v70_v3, %v71_v4  ;;  %v72_v9 = vunpack.c.l.s8.bf16 %v56_v7  ;;  %v73_v10 = vunpack.c.l.s8.bf16 %v57_v8  ;;  %v1228_v16 = vld [vmem:[%s1500_s3] sm:$0xff]  }
  0x14   :  { %1164 = vmatprep.subr.bf16.mxu0 %v1210_v15  ;;  %v989_v17 = vld [vmem:[%s1497_s1] sm:$0xff]  }
  0x15   :  { %429 = vperm.xlu0 %1203, %v411_v29   ;;  %1197 = vmatpush3.bf16.msra.mxu1 %v1220_v49  ;;  %v930_v11 = vcombine.low %v72_v9, %v73_v10 }
  0x16   :  { %1190 = vmatprep.subr.bf16.mxu1 %v1221_v53 }
  0x17   :  { %1165 = vmatpush3.bf16.msra.mxu0 %v1210_v15  ;;  %494 = vperm.xlu1 %1204, %v424_v45   ;;  %v1227_v15 = vld [vmem:[%s1500_s3 + $0x40] sm:$0xff]  }
  0x18   :  { %1166 = vmatprep.subr.bf16.mxu0 %v1211_v19 }
  0x19   :  { %489 = vperm.xlu0 %1203, %v423_v39   ;;  %1198 = vmatpush3.bf16.msra.mxu1 %v1222_v57  ;;  %v1060_v39 = vld [vmem:[%s1497_s1 + $0x8] sm:$0xff]  }
  0x1a   :  { %1191 = vmatprep.subr.bf16.mxu1 %v1223_v61 }
  0x1b   :  { %1167 = vmatpush3.bf16.msra.mxu0 %v1211_v19  ;;  %444 = vperm.xlu1 %1204, %v414_v54  }
  0x1c   :  { %1168 = vmatprep.subr.bf16.mxu0 %v1212_v24 }
  0x1d   :  { %439 = vperm.xlu0 %1203, %v413_v52   ;;  %1199 = vmatpush3.bf16.msra.mxu1 %v1224_v12  ;;  %v1062_v52 = vld [vmem:[%s1497_s1 + $0x18] sm:$0xff]  }
  0x1e   :  { %1192 = vmatprep.subr.bf16.mxu1 %v1225_v13 }
  0x1f   :  { %1169 = vmatpush3.bf16.msra.mxu0 %v1212_v24  ;;  %504 = vperm.xlu1 %1204, %v426_v0   ;;  %v1064_v0 = vld [vmem:[%s1497_s1 + $0x28] sm:$0xff]  }
  0x20   :  { %1090 = vmatprep.subr.bf16.mxu0 %v1213_v18  ;;  %v1061_v18 = vld [vmem:[%s1497_s1 + $0x10] sm:$0xff]  }
  0x21   :  { %499 = vperm.xlu0 %1203, %v425_v60   ;;  %1200 = vmatpush3.bf16.msra.mxu1 %v1226_v14 }
  0x22   :  { %1171 = vmatmul.mubr.bf16.vlgmr.msra.gmra.mxu0 %v924_v42  ;;  %1193 = vmatprep.subr.bf16.mxu1 %v1227_v15 }
  0x23   :  { %1174 = vmatprep.mubr.bf16.mxu0 %v925_v46  ;;  %1091 = vmatpush3.bf16.msra.mxu0 %v1214_v23 }
  0x24   :  { %1092 = vmatprep.subr.bf16.mxu0 %v1215_v26  ;;  %770 = vmatprep.mubr.bf16.mxu1 %v1061_v18 }
  0x25   :  { %1201 = vmatpush3.bf16.msra.mxu1 %v1228_v16 }
  0x27   :  { %1093 = vmatpush3.bf16.msra.mxu0 %v1216_v30 }
  0x28   :  { %1094 = vmatprep.subr.bf16.mxu0 %v1217_v33 }
  0x2a   :  { %1175 = vmatmul.mubr.bf16.gmra.mxu0 %v926_v55 }
  0x2b   :  { %1178 = vmatprep.mubr.bf16.mxu0 %v927_v58  ;;  %1095 = vmatpush3.bf16.msra.mxu0 %v1218_v40  ;;  %v1063_v58 = vld [vmem:[%s1497_s1 + $0x20] sm:$0xff]  }
  0x2c   :  { %1096 = vmatprep.subr.bf16.mxu0 %v1219_v41 }
  0x2f   :  { %1097 = vmatpush3.bf16.msra.mxu0 %v1220_v49 }
  0x30   :  { %1098 = vmatprep.subr.bf16.mxu0 %v1221_v53 }
  0x32   :  { %1179 = vmatmul.mubr.bf16.gmra.mxu0 %v928_v5 }
  0x33   :  { %1182 = vmatprep.mubr.bf16.mxu0 %v929_v6  ;;  %1099 = vmatpush3.bf16.msra.mxu0 %v1222_v57  ;;  %v1065_v6 = vld [vmem:[%s1497_s1 + $0x30] sm:$0xff]  }
  0x34   :  { %1100 = vmatprep.subr.bf16.mxu0 %v1223_v61 }
  0x37   :  { %1101 = vmatpush3.bf16.msra.mxu0 %v1224_v12 }
  0x38   :  { %1102 = vmatprep.subr.bf16.mxu0 %v1225_v13 }
  0x3a   :  { %1183 = vmatmul.mubr.bf16.gmra.mxu0 %v930_v11  ;;  %v1066_v11 = vld [vmem:[%s1497_s1 + $0x38] sm:$0xff]  }
  0x3b   :  { %1103 = vmatpush3.bf16.msra.mxu0 %v1226_v14  ;;  %754 = vmatprep.mubr.bf16.mxu0 %v989_v17 }
  0x3c   :  { %1104 = vmatprep.subr.bf16.mxu0 %v1227_v15 }
  0x3f   :  { %1105 = vmatpush3.bf16.msra.mxu0 %v1228_v16 }
  0x7e   :  { %v460_v19 = vpop.permute.xlu1 %459 }
  0x80   :  { %v450_v20 = vpop.permute.xlu0 %449 }
  0x82   :  { %v465_v21 = vpop.permute.xlu1 %464 }
  0x84   :  { %v455_v22 = vpop.permute.xlu0 %454 }
  0x86   :  { %v475_v23 = vpop.permute.xlu1 %474 }
  0x88   :  { %v470_v24 = vpop.permute.xlu0 %469 }
  0x8a   :  { %v485_v25 = vpop.permute.xlu1 %484 }
  0x8c   :  { %v480_v26 = vpop.permute.xlu0 %479 }
  0x8e   :  { %v435_v27 = vpop.permute.xlu1 %434 }
  0x90   :  { %v430_v28 = vpop.permute.xlu0 %429 }
  0x92   :  { %v495_v31 = vpop.permute.xlu1 %494 }
  0x94   :  { %v490_v33 = vpop.permute.xlu0 %489 }
  0x96   :  { %v445_v40 = vpop.permute.xlu1 %444 }
  0x98   :  { %v440_v42 = vpop.permute.xlu0 %439 }
  0x9a   :  { %v505_v12 = vpop.permute.xlu1 %504 }
  0x9c   :  { %v500_v14 = vpop.permute.xlu0 %499 }
  0xe2   :  { %v1172_v29 = vpop.f32.mrf.mxu0 }
  0xe3   :  { %v509_v46 = vmul.f32 %v1172_v29, %v440_v42 }
  0xe4   :  { %v204_v30 = vpop.f32.mrf.mxu0 }
  0xe5   :  { %v507_v35 = vmul.f32 %v430_v28, %v204_v30 }
  0xe6   :  { %v1173_v32 = vpop.f32.mrf.mxu0 }
  0xe7   :  { %v510_v44 = vmul.f32 %v1173_v32, %v445_v40 }
  0xe8   :  { %v207_v34 = vpop.f32.mrf.mxu0 }
  0xe9   :  { %v508_v36 = vmul.f32 %v435_v27, %v207_v34  ;;  %v573_v50 = vpack.c.bf16 %v510_v44, %v509_v46 }
  0xea   :  { %v1176_v37 = vpop.f32.mrf.mxu0 }
  0xeb   :  { %v571_v38 = vpack.c.bf16 %v508_v36, %v507_v35  ;;  %v513_v56 = vmul.f32 %v1176_v37, %v460_v19 }
  0xec   :  { %v220_v41 = vpop.f32.mrf.mxu0 }
  0xed   :  { %755 = vmatmul.mubr.bf16.vlgmr.msra.gmra.mxu0 %v571_v38  ;;  %v511_v47 = vmul.f32 %v450_v20, %v220_v41  ;;  %v1455_v20 = vld [vmem:[%s1501_s4] ss:$0 sm:$0xff] }
  0xee   :  { %v1177_v43 = vpop.f32.mrf.mxu0  ;;  %762 = vmatprep.mubr.bf16.mxu0 %v1060_v39 }
  0xef   :  { %v514_v54 = vmul.f32 %v1177_v43, %v465_v21 }
  0xf0   :  { %v223_v45 = vpop.f32.mrf.mxu0 }
  0xf1   :  { %v512_v48 = vmul.f32 %v455_v22, %v223_v45  ;;  %v577_v57 = vpack.c.bf16 %v514_v54, %v513_v56 }
  0xf2   :  { %v1180_v49 = vpop.f32.mrf.mxu0 }
  0xf3   :  { %v575_v51 = vpack.c.bf16 %v512_v48, %v511_v47  ;;  %v517_v4 = vmul.f32 %v1180_v49, %v480_v26 }
  0xf4   :  { %v236_v53 = vpop.f32.mrf.mxu0 }
  0xf5   :  { %763 = vmatmul.mubr.bf16.gmra.mxu0 %v573_v50  ;;  %771 = vmatmul.mubr.bf16.vlgmr.msra.gmra.mxu1 %v575_v51  ;;  %v515_v62 = vmul.f32 %v470_v24, %v236_v53 }
  0xf6   :  { %778 = vmatprep.mubr.bf16.mxu1 %v1062_v52  ;;  %v1181_v55 = vpop.f32.mrf.mxu0 }
  0xf7   :  { %v518_v2 = vmul.f32 %v1181_v55, %v485_v25 }
  0xf8   :  { %v239_v59 = vpop.f32.mrf.mxu0 }
  0xf9   :  { %v516_v60 = vmul.f32 %v475_v23, %v239_v59  ;;  %v581_v5 = vpack.c.bf16 %v518_v2, %v517_v4 }
  0xfa   :  { %v1184_v61 = vpop.f32.mrf.mxu0 }
  0xfb   :  { %v579_v63 = vpack.c.bf16 %v516_v60, %v515_v62  ;;  %v521_v15 = vmul.f32 %v1184_v61, %v500_v14 }
  0xfc   :  { %v252_v1 = vpop.f32.mrf.mxu0 }
  0xfd   :  { %779 = vmatmul.mubr.bf16.gmra.mxu1 %v577_v57  ;;  %v519_v9 = vmul.f32 %v490_v33, %v252_v1 }
  0xfe   :  { %786 = vmatprep.mubr.bf16.mxu1 %v1063_v58  ;;  %v1185_v3 = vpop.f32.mrf.mxu0 }
  0xff   :  { %v522_v13 = vmul.f32 %v1185_v3, %v505_v12 }
 0x100   :  { %v255_v7 = vpop.f32.mrf.mxu0 }
 0x101   :  { %v520_v8 = vmul.f32 %v495_v31, %v255_v7  ;;  %v585_v16 = vpack.c.bf16 %v522_v13, %v521_v15 }
 0x103   :  { %v583_v10 = vpack.c.bf16 %v520_v8, %v519_v9 }
 0x105   :  { %787 = vmatmul.mubr.bf16.gmra.mxu1 %v579_v63 }
 0x106   :  { %794 = vmatprep.mubr.bf16.mxu1 %v1064_v0 }
 0x10d   :  { %795 = vmatmul.mubr.bf16.gmra.mxu1 %v581_v5 }
 0x10e   :  { %802 = vmatprep.mubr.bf16.mxu1 %v1065_v6 }
 0x115   :  { %803 = vmatmul.mubr.bf16.gmra.mxu1 %v583_v10 }
 0x116   :  { %810 = vmatprep.mubr.bf16.mxu1 %v1066_v11 }
 0x11d   :  { %811 = vmatmul.mubr.bf16.gmra.mxu1 %v585_v16 }
 0x1ad   :  { %v1106_v17 = vpop.f32.mrf.mxu0 }
 0x1af   :  { %v1107_v18 = vpop.f32.mrf.mxu0 }
 0x1b0   :  { %v1108_v19 = vadd.f32 %v1107_v18, %v1106_v17 }
 0x1b1   :  { %v1109_v21 = vpop.f32.mrf.mxu0 }
 0x1b2   :  { %v757_v23 = vadd.f32 %v1108_v19, %v1455_v20 }
 0x1b3   :  { %v1110_v22 = vpop.f32.mrf.mxu0 }
 0x1b4   :  { %v1111_v24 = vadd.f32 %v1110_v22, %v1109_v21  ;;  %v819_v30 = vmax.f32 %v757_v23, 0.0 }
 0x1b5   :  { %v1112_v25 = vpop.f32.mrf.mxu0  ;;  %v1118_v26 = vpop.f32.mrf.mxu1 }
 0x1b6   :  { %v760_v27 = vadd.f32 %v1111_v24, %v1455_v20 }
 0x1b7   :  { %v1113_v28 = vpop.f32.mrf.mxu0  ;;  %v1119_v29 = vpop.f32.mrf.mxu1 }
 0x1b8   :  { %v820_v31 = vmax.f32 %v760_v27, 0.0  ;;  %v1114_v32 = vadd.f32 %v1113_v28, %v1112_v25  ;;  %v1120_v33 = vadd.f32 %v1119_v29, %v1118_v26 }
 0x1b9   :  { %v1115_v34 = vpop.f32.mrf.mxu0  ;;  %v1121_v35 = vpop.f32.mrf.mxu1 }
 0x1ba   :  { %v1023_v36 = vpack.c.bf16 %v820_v31, %v819_v30  ;;  %v765_v37 = vadd.f32 %v1114_v32, %v1455_v20  ;;  %v773_v40 = vadd.f32 %v1120_v33, %v1455_v20 }
 0x1bb   :  { %v1116_v38 = vpop.f32.mrf.mxu0  ;;  %v1122_v39 = vpop.f32.mrf.mxu1 }
 0x1bc   :  { %1024 = vst [vmem:[%s1502_s5] sm:$0xff] %v1023_v36   ;;  %v1117_v41 = vadd.f32 %v1116_v38, %v1115_v34  ;;  %v1123_v42 = vadd.f32 %v1122_v39, %v1121_v35  ;;  %v821_v46 = vmax.f32 %v765_v37, 0.0  ;;  %v823_v48 = vmax.f32 %v773_v40, 0.0 }
 0x1bd   :  { %v1124_v43 = vpop.f32.mrf.mxu1 }
 0x1be   :  { %v768_v44 = vadd.f32 %v1117_v41, %v1455_v20  ;;  %v776_v45 = vadd.f32 %v1123_v42, %v1455_v20 }
 0x1bf   :  { %v1125_v47 = vpop.f32.mrf.mxu1 }
 0x1c0   :  { %v822_v49 = vmax.f32 %v768_v44, 0.0  ;;  %v824_v50 = vmax.f32 %v776_v45, 0.0  ;;  %v1126_v51 = vadd.f32 %v1125_v47, %v1124_v43 }
 0x1c1   :  { %v1127_v52 = vpop.f32.mrf.mxu1 }
 0x1c2   :  { %v1028_v53 = vpack.c.bf16 %v822_v49, %v821_v46  ;;  %v1033_v54 = vpack.c.bf16 %v824_v50, %v823_v48  ;;  %v781_v56 = vadd.f32 %v1126_v51, %v1455_v20 }
 0x1c3   :  { %v1128_v55 = vpop.f32.mrf.mxu1 }
 0x1c4   :  { %1067 = vst [vmem:[%s1502_s5 + $0x8] sm:$0xff] %v1028_v53   ;;  %1068 = vst [vmem:[%s1502_s5 + $0x10] sm:$0xff] %v1033_v54   ;;  %v1129_v57 = vadd.f32 %v1128_v55, %v1127_v52  ;;  %v825_v61 = vmax.f32 %v781_v56, 0.0 }
 0x1c5   :  { %v1130_v58 = vpop.f32.mrf.mxu1 }
 0x1c6   :  { %v784_v59 = vadd.f32 %v1129_v57, %v1455_v20 }
 0x1c7   :  { %v1131_v60 = vpop.f32.mrf.mxu1 }
 0x1c8   :  { %v826_v62 = vmax.f32 %v784_v59, 0.0  ;;  %v1132_v63 = vadd.f32 %v1131_v60, %v1130_v58 }
 0x1c9   :  { %v1133_v0 = vpop.f32.mrf.mxu1 }
 0x1ca   :  { %v1038_v1 = vpack.c.bf16 %v826_v62, %v825_v61  ;;  %v789_v3 = vadd.f32 %v1132_v63, %v1455_v20 }
 0x1cb   :  { %v1134_v2 = vpop.f32.mrf.mxu1 }
 0x1cc   :  { %1069 = vst [vmem:[%s1502_s5 + $0x18] sm:$0xff] %v1038_v1   ;;  %v1135_v4 = vadd.f32 %v1134_v2, %v1133_v0  ;;  %v827_v8 = vmax.f32 %v789_v3, 0.0 }
 0x1cd   :  { %v1136_v5 = vpop.f32.mrf.mxu1 }
 0x1ce   :  { %v792_v6 = vadd.f32 %v1135_v4, %v1455_v20 }
 0x1cf   :  { %v1137_v7 = vpop.f32.mrf.mxu1 }
 0x1d0   :  { %v828_v9 = vmax.f32 %v792_v6, 0.0  ;;  %v1138_v10 = vadd.f32 %v1137_v7, %v1136_v5 }
 0x1d1   :  { %v1139_v11 = vpop.f32.mrf.mxu1 }
 0x1d2   :  { %v1043_v12 = vpack.c.bf16 %v828_v9, %v827_v8  ;;  %v797_v14 = vadd.f32 %v1138_v10, %v1455_v20 }
 0x1d3   :  { %v1140_v13 = vpop.f32.mrf.mxu1 }
 0x1d4   :  { %1070 = vst [vmem:[%s1502_s5 + $0x20] sm:$0xff] %v1043_v12   ;;  %v1141_v15 = vadd.f32 %v1140_v13, %v1139_v11  ;;  %v829_v19 = vmax.f32 %v797_v14, 0.0 }
 0x1d5   :  { %v1142_v16 = vpop.f32.mrf.mxu1 }
 0x1d6   :  { %v800_v17 = vadd.f32 %v1141_v15, %v1455_v20 }
 0x1d7   :  { %v1143_v18 = vpop.f32.mrf.mxu1 }
 0x1d8   :  { %v830_v21 = vmax.f32 %v800_v17, 0.0  ;;  %v1144_v22 = vadd.f32 %v1143_v18, %v1142_v16 }
 0x1d9   :  { %v1145_v23 = vpop.f32.mrf.mxu1 }
 0x1da   :  { %v1048_v24 = vpack.c.bf16 %v830_v21, %v829_v19  ;;  %v805_v26 = vadd.f32 %v1144_v22, %v1455_v20 }
 0x1db   :  { %v1146_v25 = vpop.f32.mrf.mxu1 }
 0x1dc   :  { %1071 = vst [vmem:[%s1502_s5 + $0x28] sm:$0xff] %v1048_v24   ;;  %v1147_v27 = vadd.f32 %v1146_v25, %v1145_v23  ;;  %v831_v31 = vmax.f32 %v805_v26, 0.0 }
 0x1dd   :  { %v1148_v28 = vpop.f32.mrf.mxu1 }
 0x1de   :  { %v808_v29 = vadd.f32 %v1147_v27, %v1455_v20 }
 0x1df   :  { %v1149_v30 = vpop.f32.mrf.mxu1 }
 0x1e0   :  { %v832_v32 = vmax.f32 %v808_v29, 0.0  ;;  %v1150_v33 = vadd.f32 %v1149_v30, %v1148_v28 }
 0x1e1   :  { %v1151_v34 = vpop.f32.mrf.mxu1 }
 0x1e2   :  { %v1053_v35 = vpack.c.bf16 %v832_v32, %v831_v31  ;;  %v813_v37 = vadd.f32 %v1150_v33, %v1455_v20 }
 0x1e3   :  { %v1152_v36 = vpop.f32.mrf.mxu1 }
 0x1e4   :  { %1072 = vst [vmem:[%s1502_s5 + $0x30] sm:$0xff] %v1053_v35   ;;  %v1153_v38 = vadd.f32 %v1152_v36, %v1151_v34  ;;  %v833_v40 = vmax.f32 %v813_v37, 0.0 }
 0x1e6   :  { %v816_v39 = vadd.f32 %v1153_v38, %v1455_v20 }
 0x1e8   :  { %v834_v41 = vmax.f32 %v816_v39, 0.0 }
 0x1ea   :  { %v1058_v42 = vpack.c.bf16 %v834_v41, %v833_v40 }
 0x1ec   :  { %1073 = vst [vmem:[%s1502_s5 + $0x38] sm:$0xff] %v1058_v42  }

</bundles_post_ra>
